<compile_context>
chip_gen: v7x
topology: tpu7x:2x2x1
jax: 0.10.0
libtpu: 0.0.40
codegen_flags: <defaults>
</compile_context>

<pallas_src>
import functools

import numpy as np

import jax
import jax.numpy as jnp
from jax import lax
from jax.experimental import pallas as pl
from jax.experimental.pallas import tpu as pltpu


def _make_fused_kernel(n_phase, cout, inv_cnt, eps):
    """Fused sub-pixel ConvTranspose2d + BatchNorm(train) + ReLU, single invocation."""

    def kernel(x_ref, w_ref, gb_ref, o_ref):
        # x_ref : (n_shift^2*CIN, N*OY*OX)      bf16  shared im2col RHS (rows: (hs,ws,c))
        # w_ref : (n_phase*COUT, n_shift^2*CIN) bf16  phase-scattered sub-pixel weights
        # gb_ref: (COUT, 2)                     f32   [:,0]=gamma, [:,1]=beta
        # o_ref : (n_phase, COUT, N*OY*OX)      f32   lane-dense output
        # One MXU matmul for all phases and all batch elements (f32 accumulation).
        y = jnp.dot(w_ref[...], x_ref[...], preferred_element_type=jnp.float32)
        ys = [y[p * cout:(p + 1) * cout] for p in range(n_phase)]   # vreg-aligned slices

        # BatchNorm (batch statistics, biased variance) over (phase, N*OY*OX) per
        # channel: lane-reduce each phase block, then add the tiny (COUT,1) partials.
        mean = sum(jnp.sum(yp, axis=1, keepdims=True) for yp in ys) * inv_cnt
        var = sum(jnp.sum((yp - mean) * (yp - mean), axis=1, keepdims=True)
                  for yp in ys) * inv_cnt
        scale = gb_ref[:, 0:1] * lax.rsqrt(var + eps)               # (COUT, 1)
        shift = gb_ref[:, 1:2]                                      # (COUT, 1)

        # Per-phase normalize + ReLU, unmasked full-lane (512) stores.
        for p in range(n_phase):
            o_ref[p] = jnp.maximum((ys[p] - mean) * scale + shift, 0.0)

    return kernel


@functools.partial(jax.jit, static_argnames=("stride", "padding", "eps"))
def conv_transpose2d_bn_relu(x_nchw, w_t, gamma, beta, *, stride, padding, eps=1e-5):
    N, CIN, H, W = x_nchw.shape
    CIN2, COUT, K, K2 = w_t.shape
    assert CIN2 == CIN and K2 == K
    s = stride
    Hout = (H - 1) * s - 2 * padding + K
    Wout = (W - 1) * s - 2 * padding + K
    assert (K - 2 * padding) % s == 0, \
        "sub-pixel decomposition requires (K - 2*padding) % stride == 0"

    padp = K - 1 - padding                    # padding of the equivalent direct conv
    T = -(-K // s)                            # taps per phase: ceil(K / stride)
    OY, OX = Hout // s, Wout // s             # per-phase output grid
    OXY = OY * OX
    NOXY = N * OXY
    n_phase = s * s

    # Static sub-pixel geometry: output row oh = s*oy + ph reads kernel rows
    # kh = r[ph] + s*th and (padded) input rows ih = oy + th + d[ph] + pb.
    r = [(padp - ph) % s for ph in range(s)]
    d = [(ph + r[ph] - padp) // s for ph in range(s)]
    pb = max(0, -min(d))
    pa_h = max(0, (OY - 1) + max(d) + (T - 1) - (H - 1))
    pa_w = max(0, (OX - 1) + max(d) + (T - 1) - (W - 1))
    shifts = sorted({d[ph] + t + pb for ph in range(s) for t in range(T)})
    n_sh = len(shifts)
    spos = {v: i for i, v in enumerate(shifts)}
    KKC = n_sh * n_sh * CIN

    # ---- layout glue (few ops): channel-major padded input -> shared im2col RHS ----
    xc = jnp.transpose(x_nchw, (1, 0, 2, 3)).astype(jnp.float32)        # (CIN, N, H, W)
    xpad = jnp.pad(xc, ((0, 0), (0, 0), (pb, pa_h), (pb, pa_w)))
    slabs = [xpad[:, :, hs:hs + OY, ws:ws + OX] for hs in shifts for ws in shifts]
    rhs = jnp.stack(slabs, axis=0).reshape(KKC, NOXY).astype(jnp.bfloat16)

    # ---- scatter ConvTranspose weights into the (phase, shift) column layout ----
    # Column (si, c) of phase p holds w_t[c, :, K-1-kh, K-1-kw] if shift si corresponds
    # to tap (th, tw) of that phase, else 0 (sentinel column K*K).
    idx = np.full((n_phase, n_sh * n_sh), K * K, dtype=np.int32)
    for ph in range(s):
        for pw in range(s):
            p = ph * s + pw
            for th in range(T):
                for tw in range(T):
                    kh = r[ph] + s * th
                    kw = r[pw] + s * tw
                    if kh < K and kw < K:
                        si = spos[d[ph] + th + pb] * n_sh + spos[d[pw] + tw + pb]
                        idx[p, si] = (K - 1 - kh) * K + (K - 1 - kw)
    w_flat = jnp.concatenate(
        [w_t.reshape(CIN, COUT, K * K), jnp.zeros((CIN, COUT, 1), w_t.dtype)], axis=-1)
    w_g = jnp.take(w_flat, jnp.asarray(idx), axis=2)        # (CIN, COUT, n_phase, n_sh^2)
    w_all = jnp.transpose(w_g, (2, 1, 3, 0)).reshape(n_phase * COUT, KKC)
    w_all = w_all.astype(jnp.bfloat16)

    gb = jnp.stack([gamma.astype(jnp.float32), beta.astype(jnp.float32)], axis=1)  # (COUT,2)

    # ---- fused Pallas kernel: one matmul + BatchNorm + ReLU, single invocation ----
    out_flat = pl.pallas_call(
        _make_fused_kernel(n_phase, COUT, 1.0 / float(N * Hout * Wout), float(eps)),
        out_shape=jax.ShapeDtypeStruct((n_phase, COUT, NOXY), jnp.float32),
        grid_spec=pltpu.PrefetchScalarGridSpec(
            num_scalar_prefetch=0,
            grid=(1,),
            in_specs=[
                pl.BlockSpec((KKC, NOXY), lambda i: (0, 0)),
                pl.BlockSpec((n_phase * COUT, KKC), lambda i: (0, 0)),
                pl.BlockSpec((COUT, 2), lambda i: (0, 0)),
            ],
            out_specs=pl.BlockSpec((n_phase, COUT, NOXY), lambda i: (0, 0, 0)),
        ),
        compiler_params=pltpu.CompilerParams(dimension_semantics=("arbitrary",)),
    )(rhs, w_all, gb)

    # ---- layout glue: de-interleave phases back to NCHW ----
    out = out_flat.reshape(s, s, COUT, N, OY, OX)            # (ph, pw, co, n, oy, ox)
    out = jnp.transpose(out, (3, 2, 4, 0, 5, 1))             # (n, co, oy, ph, ox, pw)
    return out.reshape(N, COUT, Hout, Wout)


def _reference(x_nchw, w_t, gamma, beta, stride, padding, eps=1e-5,
               operand_dtype=jnp.float32):
    # Pure-JAX reference via zero-upsampled direct convolution (independent of the
    # sub-pixel derivation used by the kernel).  operand_dtype mirrors the kernel's
    # bf16 matmul operands when set to bfloat16; accumulation is always f32.
    N, CIN, H, W = x_nchw.shape
    _, COUT, K, _ = w_t.shape
    Hout = (H - 1) * stride - 2 * padding + K
    Wout = (W - 1) * stride - 2 * padding + K
    x = jnp.transpose(x_nchw, (0, 2, 3, 1)).astype(jnp.float32)
    Hu, Wu = (H - 1) * stride + 1, (W - 1) * stride + 1
    xu = jnp.zeros((N, Hu, Wu, CIN), jnp.float32).at[:, ::stride, ::stride, :].set(x)
    pad = K - 1 - padding
    xp = jnp.pad(xu, ((0, 0), (pad, pad), (pad, pad), (0, 0))).astype(operand_dtype)
    w_conv = jnp.transpose(w_t, (2, 3, 0, 1))[::-1, ::-1, :, :].astype(operand_dtype)
    y = jnp.zeros((N, Hout, Wout, COUT), jnp.float32)
    for kh in range(K):
        for kw in range(K):
            y = y + jnp.einsum('nhwc,co->nhwo',
                               xp[:, kh:kh + Hout, kw:kw + Wout, :], w_conv[kh, kw],
                               preferred_element_type=jnp.float32)
    mean = y.mean(axis=(0, 1, 2))
    var = y.var(axis=(0, 1, 2))
    y = (y - mean) / jnp.sqrt(var + eps) * gamma + beta
    y = jnp.maximum(y, 0.0)
    return jnp.transpose(y, (0, 3, 1, 2))


if __name__ == "__main__":
    # Module hyper-params: ConvTranspose2d(4, 8, kernel_size=4, stride=2, padding=1)
    N, CIN, H, W = 2, 4, 16, 16
    COUT, K, STRIDE, PAD = 8, 4, 2, 1

    key = jax.random.PRNGKey(0)
    kx, kw, kg, kb = jax.random.split(key, 4)
    x = jax.random.normal(kx, (N, CIN, H, W), jnp.float32)
    w_t = 0.1 * jax.random.normal(kw, (CIN, COUT, K, K), jnp.float32)   # (Cin, Cout, kH, kW)
    gamma = jax.random.uniform(kg, (COUT,), jnp.float32, 0.5, 1.5)      # BN weight
    beta = 0.1 * jax.random.normal(kb, (COUT,), jnp.float32)            # BN bias

    out = conv_transpose2d_bn_relu(x, w_t, gamma, beta, stride=STRIDE, padding=PAD)
    out = jax.block_until_ready(out)
    assert out.shape == (N, COUT, (H - 1) * STRIDE - 2 * PAD + K,
                         (W - 1) * STRIDE - 2 * PAD + K)

    # Tight check vs a matched-precision (bf16-operand, f32-accum) reference: validates
    # the Pallas kernel math (sub-pixel decomposition, fused BN+ReLU) exactly.
    ref_bf16 = jax.block_until_ready(
        _reference(x, w_t, gamma, beta, STRIDE, PAD, operand_dtype=jnp.bfloat16))
    assert jnp.allclose(out, ref_bf16, atol=2e-3, rtol=2e-3), "mismatch vs bf16-op reference"

    # Looser check vs the full-f32 reference: confirms the bf16 operand cast keeps the
    # module's forward semantics to within ~1% (f32 accumulation throughout).
    ref_f32 = jax.block_until_ready(
        _reference(x, w_t, gamma, beta, STRIDE, PAD, operand_dtype=jnp.float32))
    assert jnp.allclose(out, ref_f32, atol=5e-2, rtol=5e-2), "mismatch vs f32 reference"

    print("KERNEL_OK")
</pallas_src>

<mosaic_0001>
module attributes {stable_mosaic.version = 11 : i64} {
  func.func @kernel(%arg0: i32, %arg1: memref<36x512xbf16, #tpu.memory_space<vmem>>, %arg2: memref<32x36xbf16, #tpu.memory_space<vmem>>, %arg3: memref<8x2xf32, #tpu.memory_space<vmem>>, %arg4: memref<4x8x512xf32, #tpu.memory_space<vmem>>) attributes {dimension_semantics = [#tpu.dimension_semantics<arbitrary>], iteration_bounds = array<i64: 1>, scalar_prefetch = 0 : i64, scratch_operands = 0 : i64, tpu.core_type = #tpu.core_type<tc>, window_params = [{pipeline_mode = #tpu.pipeline_mode<synchronous>, transform_indices = @transform_0, window_bounds = array<i64: 36, 512>}, {pipeline_mode = #tpu.pipeline_mode<synchronous>, transform_indices = @transform_1, window_bounds = array<i64: 32, 36>}, {pipeline_mode = #tpu.pipeline_mode<synchronous>, transform_indices = @transform_2, window_bounds = array<i64: 8, 2>}, {pipeline_mode = #tpu.pipeline_mode<synchronous>, transform_indices = @transform_3, window_bounds = array<i64: 4, 8, 512>}]} {
    %c0 = arith.constant 0 : index
    %c0_0 = arith.constant 0 : index
    %0 = vector.load %arg2[%c0, %c0_0] : memref<32x36xbf16, #tpu.memory_space<vmem>>, vector<32x36xbf16>
    %c0_1 = arith.constant 0 : index
    %c0_2 = arith.constant 0 : index
    %1 = vector.load %arg1[%c0_1, %c0_2] : memref<36x512xbf16, #tpu.memory_space<vmem>>, vector<36x512xbf16>
    %cst = arith.constant dense<0.000000e+00> : vector<32x512xf32>
    %2 = tpu.matmul %0, %1, %cst {dimension_numbers = #tpu.dot_dimension_numbers<[1], [0], [0], [1], [0, 0, 1, 1], [], []>} : vector<32x36xbf16>, vector<36x512xbf16>, vector<32x512xf32> -> vector<32x512xf32>
    %3 = vector.extract_strided_slice %2 {offsets = [0, 0], sizes = [8, 512], strides = [1, 1]} : vector<32x512xf32> to vector<8x512xf32>
    %4 = vector.extract_strided_slice %2 {offsets = [8, 0], sizes = [8, 512], strides = [1, 1]} : vector<32x512xf32> to vector<8x512xf32>
    %5 = vector.extract_strided_slice %2 {offsets = [16, 0], sizes = [8, 512], strides = [1, 1]} : vector<32x512xf32> to vector<8x512xf32>
    %6 = vector.extract_strided_slice %2 {offsets = [24, 0], sizes = [8, 512], strides = [1, 1]} : vector<32x512xf32> to vector<8x512xf32>
    %cst_3 = arith.constant dense<0.000000e+00> : vector<8xf32>
    %7 = vector.multi_reduction <add>, %3, %cst_3 [1] : vector<8x512xf32> to vector<8xf32>
    %8 = vector.shape_cast %7 : vector<8xf32> to vector<8x1xf32>
    %cst_4 = arith.constant 0.000000e+00 : f32
    %9 = vector.broadcast %cst_4 : f32 to vector<8x1xf32>
    %10 = arith.addf %9, %8 : vector<8x1xf32>
    %cst_5 = arith.constant dense<0.000000e+00> : vector<8xf32>
    %11 = vector.multi_reduction <add>, %4, %cst_5 [1] : vector<8x512xf32> to vector<8xf32>
    %12 = vector.shape_cast %11 : vector<8xf32> to vector<8x1xf32>
    %13 = arith.addf %10, %12 : vector<8x1xf32>
    %cst_6 = arith.constant dense<0.000000e+00> : vector<8xf32>
    %14 = vector.multi_reduction <add>, %5, %cst_6 [1] : vector<8x512xf32> to vector<8xf32>
    %15 = vector.shape_cast %14 : vector<8xf32> to vector<8x1xf32>
    %16 = arith.addf %13, %15 : vector<8x1xf32>
    %cst_7 = arith.constant dense<0.000000e+00> : vector<8xf32>
    %17 = vector.multi_reduction <add>, %6, %cst_7 [1] : vector<8x512xf32> to vector<8xf32>
    %18 = vector.shape_cast %17 : vector<8xf32> to vector<8x1xf32>
    %19 = arith.addf %16, %18 : vector<8x1xf32>
    %cst_8 = arith.constant 4.8828125E-4 : f32
    %20 = vector.broadcast %cst_8 : f32 to vector<8x1xf32>
    %21 = arith.mulf %19, %20 : vector<8x1xf32>
    %22 = vector.broadcast %21 : vector<8x1xf32> to vector<8x512xf32>
    %23 = arith.subf %3, %22 : vector<8x512xf32>
    %24 = vector.broadcast %21 : vector<8x1xf32> to vector<8x512xf32>
    %25 = arith.subf %3, %24 : vector<8x512xf32>
    %26 = arith.mulf %23, %25 : vector<8x512xf32>
    %cst_9 = arith.constant dense<0.000000e+00> : vector<8xf32>
    %27 = vector.multi_reduction <add>, %26, %cst_9 [1] : vector<8x512xf32> to vector<8xf32>
    %28 = vector.shape_cast %27 : vector<8xf32> to vector<8x1xf32>
    %cst_10 = arith.constant 0.000000e+00 : f32
    %29 = vector.broadcast %cst_10 : f32 to vector<8x1xf32>
    %30 = arith.addf %29, %28 : vector<8x1xf32>
    %31 = vector.broadcast %21 : vector<8x1xf32> to vector<8x512xf32>
    %32 = arith.subf %4, %31 : vector<8x512xf32>
    %33 = vector.broadcast %21 : vector<8x1xf32> to vector<8x512xf32>
    %34 = arith.subf %4, %33 : vector<8x512xf32>
    %35 = arith.mulf %32, %34 : vector<8x512xf32>
    %cst_11 = arith.constant dense<0.000000e+00> : vector<8xf32>
    %36 = vector.multi_reduction <add>, %35, %cst_11 [1] : vector<8x512xf32> to vector<8xf32>
    %37 = vector.shape_cast %36 : vector<8xf32> to vector<8x1xf32>
    %38 = arith.addf %30, %37 : vector<8x1xf32>
    %39 = vector.broadcast %21 : vector<8x1xf32> to vector<8x512xf32>
    %40 = arith.subf %5, %39 : vector<8x512xf32>
    %41 = vector.broadcast %21 : vector<8x1xf32> to vector<8x512xf32>
    %42 = arith.subf %5, %41 : vector<8x512xf32>
    %43 = arith.mulf %40, %42 : vector<8x512xf32>
    %cst_12 = arith.constant dense<0.000000e+00> : vector<8xf32>
    %44 = vector.multi_reduction <add>, %43, %cst_12 [1] : vector<8x512xf32> to vector<8xf32>
    %45 = vector.shape_cast %44 : vector<8xf32> to vector<8x1xf32>
    %46 = arith.addf %38, %45 : vector<8x1xf32>
    %47 = vector.broadcast %21 : vector<8x1xf32> to vector<8x512xf32>
    %48 = arith.subf %6, %47 : vector<8x512xf32>
    %49 = vector.broadcast %21 : vector<8x1xf32> to vector<8x512xf32>
    %50 = arith.subf %6, %49 : vector<8x512xf32>
    %51 = arith.mulf %48, %50 : vector<8x512xf32>
    %cst_13 = arith.constant dense<0.000000e+00> : vector<8xf32>
    %52 = vector.multi_reduction <add>, %51, %cst_13 [1] : vector<8x512xf32> to vector<8xf32>
    %53 = vector.shape_cast %52 : vector<8xf32> to vector<8x1xf32>
    %54 = arith.addf %46, %53 : vector<8x1xf32>
    %cst_14 = arith.constant 4.8828125E-4 : f32
    %55 = vector.broadcast %cst_14 : f32 to vector<8x1xf32>
    %56 = arith.mulf %54, %55 : vector<8x1xf32>
    %c0_15 = arith.constant 0 : index
    %c0_16 = arith.constant 0 : index
    %57 = vector.load %arg3[%c0_15, %c0_16] : memref<8x2xf32, #tpu.memory_space<vmem>>, vector<8x1xf32>
    %cst_17 = arith.constant 9.99999974E-6 : f32
    %58 = vector.broadcast %cst_17 : f32 to vector<8x1xf32>
    %59 = arith.addf %56, %58 : vector<8x1xf32>
    %60 = math.rsqrt %59 : vector<8x1xf32>
    %61 = arith.mulf %57, %60 : vector<8x1xf32>
    %c0_18 = arith.constant 0 : index
    %c1 = arith.constant 1 : index
    %62 = vector.load %arg3[%c0_18, %c1] : memref<8x2xf32, #tpu.memory_space<vmem>>, vector<8x1xf32>
    %63 = vector.broadcast %21 : vector<8x1xf32> to vector<8x512xf32>
    %64 = arith.subf %3, %63 : vector<8x512xf32>
    %65 = vector.broadcast %61 : vector<8x1xf32> to vector<8x512xf32>
    %66 = arith.mulf %64, %65 : vector<8x512xf32>
    %67 = vector.broadcast %62 : vector<8x1xf32> to vector<8x512xf32>
    %68 = arith.addf %66, %67 : vector<8x512xf32>
    %cst_19 = arith.constant 0.000000e+00 : f32
    %69 = vector.broadcast %cst_19 : f32 to vector<8x512xf32>
    %70 = arith.maximumf %68, %69 : vector<8x512xf32>
    %c0_20 = arith.constant 0 : index
    %c0_21 = arith.constant 0 : index
    %c0_22 = arith.constant 0 : index
    %71 = vector.load %arg4[%c0_20, %c0_21, %c0_22] : memref<4x8x512xf32, #tpu.memory_space<vmem>>, vector<1x8x512xf32>
    %72 = vector.shape_cast %71 : vector<1x8x512xf32> to vector<8x512xf32>
    %73 = vector.shape_cast %70 : vector<8x512xf32> to vector<1x8x512xf32>
    tpu.vector_store %arg4[%c0_20, %c0_21, %c0_22], %73 {strides = array<i32>} : memref<4x8x512xf32, #tpu.memory_space<vmem>>, vector<1x8x512xf32>,
    %74 = vector.broadcast %21 : vector<8x1xf32> to vector<8x512xf32>
    %75 = arith.subf %4, %74 : vector<8x512xf32>
    %76 = vector.broadcast %61 : vector<8x1xf32> to vector<8x512xf32>
    %77 = arith.mulf %75, %76 : vector<8x512xf32>
    %78 = vector.broadcast %62 : vector<8x1xf32> to vector<8x512xf32>
    %79 = arith.addf %77, %78 : vector<8x512xf32>
    %cst_23 = arith.constant 0.000000e+00 : f32
    %80 = vector.broadcast %cst_23 : f32 to vector<8x512xf32>
    %81 = arith.maximumf %79, %80 : vector<8x512xf32>
    %c1_24 = arith.constant 1 : index
    %c0_25 = arith.constant 0 : index
    %c0_26 = arith.constant 0 : index
    %82 = vector.load %arg4[%c1_24, %c0_25, %c0_26] : memref<4x8x512xf32, #tpu.memory_space<vmem>>, vector<1x8x512xf32>
    %83 = vector.shape_cast %82 : vector<1x8x512xf32> to vector<8x512xf32>
    %84 = vector.shape_cast %81 : vector<8x512xf32> to vector<1x8x512xf32>
    tpu.vector_store %arg4[%c1_24, %c0_25, %c0_26], %84 {strides = array<i32>} : memref<4x8x512xf32, #tpu.memory_space<vmem>>, vector<1x8x512xf32>,
    %85 = vector.broadcast %21 : vector<8x1xf32> to vector<8x512xf32>
    %86 = arith.subf %5, %85 : vector<8x512xf32>
    %87 = vector.broadcast %61 : vector<8x1xf32> to vector<8x512xf32>
    %88 = arith.mulf %86, %87 : vector<8x512xf32>
    %89 = vector.broadcast %62 : vector<8x1xf32> to vector<8x512xf32>
    %90 = arith.addf %88, %89 : vector<8x512xf32>
    %cst_27 = arith.constant 0.000000e+00 : f32
    %91 = vector.broadcast %cst_27 : f32 to vector<8x512xf32>
    %92 = arith.maximumf %90, %91 : vector<8x512xf32>
    %c2 = arith.constant 2 : index
    %c0_28 = arith.constant 0 : index
    %c0_29 = arith.constant 0 : index
    %93 = vector.load %arg4[%c2, %c0_28, %c0_29] : memref<4x8x512xf32, #tpu.memory_space<vmem>>, vector<1x8x512xf32>
    %94 = vector.shape_cast %93 : vector<1x8x512xf32> to vector<8x512xf32>
    %95 = vector.shape_cast %92 : vector<8x512xf32> to vector<1x8x512xf32>
    tpu.vector_store %arg4[%c2, %c0_28, %c0_29], %95 {strides = array<i32>} : memref<4x8x512xf32, #tpu.memory_space<vmem>>, vector<1x8x512xf32>,
    %96 = vector.broadcast %21 : vector<8x1xf32> to vector<8x512xf32>
    %97 = arith.subf %6, %96 : vector<8x512xf32>
    %98 = vector.broadcast %61 : vector<8x1xf32> to vector<8x512xf32>
    %99 = arith.mulf %97, %98 : vector<8x512xf32>
    %100 = vector.broadcast %62 : vector<8x1xf32> to vector<8x512xf32>
    %101 = arith.addf %99, %100 : vector<8x512xf32>
    %cst_30 = arith.constant 0.000000e+00 : f32
    %102 = vector.broadcast %cst_30 : f32 to vector<8x512xf32>
    %103 = arith.maximumf %101, %102 : vector<8x512xf32>
    %c3 = arith.constant 3 : index
    %c0_31 = arith.constant 0 : index
    %c0_32 = arith.constant 0 : index
    %104 = vector.load %arg4[%c3, %c0_31, %c0_32] : memref<4x8x512xf32, #tpu.memory_space<vmem>>, vector<1x8x512xf32>
    %105 = vector.shape_cast %104 : vector<1x8x512xf32> to vector<8x512xf32>
    %106 = vector.shape_cast %103 : vector<8x512xf32> to vector<1x8x512xf32>
    tpu.vector_store %arg4[%c3, %c0_31, %c0_32], %106 {strides = array<i32>} : memref<4x8x512xf32, #tpu.memory_space<vmem>>, vector<1x8x512xf32>,
    return
  }
  func.func @transform_0(%arg0: i32) -> (i32, i32) {
    %c0_i32 = arith.constant 0 : i32
    %c0_i32_0 = arith.constant 0 : i32
    %c0_i32_1 = arith.constant 0 : i32
    return %c0_i32, %c0_i32_0 : i32, i32
  }
  func.func @transform_1(%arg0: i32) -> (i32, i32) {
    %c0_i32 = arith.constant 0 : i32
    %c0_i32_0 = arith.constant 0 : i32
    %c0_i32_1 = arith.constant 0 : i32
    return %c0_i32, %c0_i32_0 : i32, i32
  }
  func.func @transform_2(%arg0: i32) -> (i32, i32) {
    %c0_i32 = arith.constant 0 : i32
    %c0_i32_0 = arith.constant 0 : i32
    %c0_i32_1 = arith.constant 0 : i32
    return %c0_i32, %c0_i32_0 : i32, i32
  }
  func.func @transform_3(%arg0: i32) -> (i32, i32, i32) {
    %c0_i32 = arith.constant 0 : i32
    %c0_i32_0 = arith.constant 0 : i32
    %c0_i32_1 = arith.constant 0 : i32
    %c0_i32_2 = arith.constant 0 : i32
    return %c0_i32, %c0_i32_0, %c0_i32_1 : i32, i32, i32
  }
}

</mosaic_0001>

<bundles_post_ra>
// kernel: conv_transpose2d_bn_relu.1
= control target key start
LH: loop header
LB: loop body
LE: loop exit
PB: predicated region body
PF: predicated region fallthrough
CT: control target
= control target key end

     0   :  { %v439_v1 = vmov 0   ;;  %vm96_vm0 = vcmask 1041408   ;;  %vm89_vm1 = vcmask 293888   ;;  %s607_s0 = inlined_call_operand.vmem [shape: bf16[36,512], index: 0, kind: input, shape index: {}]   ;;  %s608_s1 = inlined_call_operand.vmem [shape: bf16[32,36], index: 1, kind: input, shape index: {}]   ;;  %s609_s2 = inlined_call_operand.vmem [shape: f32[8,2], index: 2, kind: input, shape index: {}]   ;;  %s610_s3 = inlined_call_operand.vmem [shape: f32[4,8,512], index: 3, kind: output, shape index: {}]  }
   0x1   :  { %v419_v0 = vld [vmem:[%s607_s0 + $0x4] ss:$16 sps:$4 sm:$0xff]   ;;  %141 = vmatprep.mubr.bf16.mxu0 %v439_v1  ;;  %194 = vmatprep.mubr.bf16.mxu1 %v439_v1  ;;  %v421_v2 = vld [vmem:[%s607_s0 + $0xc] ss:$16 sps:$4 sm:$0xff]   ;;  %v423_v3 = vld [vmem:[%s607_s0] ss:$16 sps:$4 sm:$0xff]  }
   0x2   :  { %416 = vset.pattern.permute.xlu0 %v439_v1  ;;  %109 = vmatprep.subr.bf16.mxu0 %v419_v0  ;;  %v424_v4 = vld [vmem:[%s607_s0 + $0x8] ss:$16 sps:$4 sm:$0xff]   ;;  %v425_v5 = vld [vmem:[%s607_s0 + $0x24] ss:$16 sps:$4 sm:$0xff]   ;;  %v427_v6 = vld [vmem:[%s607_s0 + $0x2c] ss:$16 sps:$4 sm:$0xff]  }
   0x3   :  { %162 = vmatprep.subr.bf16.mxu1 %v421_v2  ;;  %110 = vmatpush1.bf16.msra.mxu0 %v423_v3  ;;  %v429_v7 = vld [vmem:[%s607_s0 + $0x20] ss:$16 sps:$4 sm:$0xff]   ;;  %v430_v8 = vld [vmem:[%s607_s0 + $0x28] ss:$16 sps:$4 sm:$0xff]  }
   0x4   :  { %163 = vmatpush1.bf16.msra.mxu1 %v424_v4  ;;  %111 = vmatprep.subr.bf16.mxu0 %v425_v5  ;;  %v27_v9 = vld [vmem:[%s607_s0 + $0x40] sm:$0x33]  ;;  %v28_v10 = vld [vmem:[%s607_s0 + $0x48] sm:$0x33] }
   0x5   :  { %164 = vmatprep.subr.bf16.mxu1 %v427_v6  ;;  %v393_v11 = vcombine.high %v27_v9, %v27_v9  ;;  %v395_v12 = vcombine.high %v28_v10, %v28_v10  ;;  %v392_v13 = vcombine.low %v27_v9, %v27_v9  ;;  %v394_v14 = vcombine.low %v28_v10, %v28_v10  ;;  %v435_v17 = vld [vmem:[%s608_s1] sm:$0xff]   ;;  %v436_v18 = vld [vmem:[%s608_s1 + $0x8] sm:$0xff]  }
   0x7   :  { %112 = vmatpush1.bf16.msra.mxu0 %v429_v7  ;;  %v98_v15 = vsel %vm96_vm0, %v392_v13, 0  ;;  %v104_v16 = vsel %vm96_vm0, %v394_v14, 0 }
   0x8   :  { %165 = vmatpush1.bf16.msra.mxu1 %v430_v8  ;;  %396 = vmatprep.subr.msk.bf16.mxu0 %vm96_vm0, %v393_v11 }
   0x9   :  { %399 = vmatprep.subr.msk.bf16.mxu1 %vm96_vm0, %v395_v12 }
   0xb   :  { %114 = vmatpush1.bf16.msra.mxu0 %v98_v15 }
   0xc   :  { %167 = vmatpush1.bf16.msra.mxu1 %v104_v16 }
   0xe   :  { %397 = vmatmul.mubr.msk.bf16.vlgmr.msra.gmra.mrb[0].mxu0 %vm89_vm1, %v435_v17 }
   0xf   :  { %400 = vmatmul.mubr.msk.bf16.vlgmr.msra.gmra.mrb[0].mxu1 %vm89_vm1, %v435_v17  ;;  %151 = vmatprep.mubr.bf16.mxu0 %v439_v1 }
  0x10   :  { %204 = vmatprep.mubr.bf16.mxu1 %v439_v1 }
  0x16   :  { %398 = vmatmul.mubr.msk.bf16.gmra.mrb[4].mxu0 %vm89_vm1, %v436_v18 }
  0x17   :  { %401 = vmatmul.mubr.msk.bf16.gmra.mrb[4].mxu1 %vm89_vm1, %v436_v18 }
  0xe1   :  { %v143_v19 = vpop.f32.mrb[0].mxu0 }
  0xe2   :  { %v196_v20 = vpop.f32.mrb[0].mxu1  ;;  %v145_v21 = vpop.f32.mrb[1].mxu0 }
  0xe3   :  { %v198_v22 = vpop.f32.mrb[1].mxu1  ;;  %v215_v23 = vadd.f32 %v145_v21, %v143_v19  ;;  %v147_v24 = vpop.f32.mrb[2].mxu0 }
  0xe4   :  { %v200_v25 = vpop.f32.mrb[2].mxu1  ;;  %v149_v26 = vpop.f32.mrb[3].mxu0 }
  0xe5   :  { %v202_v27 = vpop.f32.mrb[3].mxu1  ;;  %v221_v28 = vadd.f32 %v149_v26, %v147_v24  ;;  %v216_v29 = vadd.f32 %v215_v23, %v196_v20 }
  0xe7   :  { %v217_v30 = vadd.f32 %v216_v29, %v198_v22  ;;  %v222_v31 = vadd.f32 %v221_v28, %v200_v25 }
  0xe9   :  { %218 = vadd.xlane.f32.xlu0 %v217_v30  ;;  %v153_v33 = vpop.f32.mrb[4].mxu0  ;;  %v223_v34 = vadd.f32 %v222_v31, %v202_v27 }
  0xea   :  { %v206_v32 = vpop.f32.mrb[4].mxu1  ;;  %v155_v35 = vpop.f32.mrb[5].mxu0 }
  0xeb   :  { %v208_v36 = vpop.f32.mrb[5].mxu1  ;;  %v227_v37 = vadd.f32 %v155_v35, %v153_v33  ;;  %v157_v38 = vpop.f32.mrb[6].mxu0 }
  0xec   :  { %v210_v39 = vpop.f32.mrb[6].mxu1  ;;  %v159_v40 = vpop.f32.mrb[7].mxu0 }
  0xed   :  { %v212_v41 = vpop.f32.mrb[7].mxu1  ;;  %v233_v42 = vadd.f32 %v159_v40, %v157_v38  ;;  %224 = vadd.xlane.f32.xlu0 %v223_v34  ;;  %v228_v43 = vadd.f32 %v227_v37, %v206_v32 }
  0xef   :  { %v234_v44 = vadd.f32 %v233_v42, %v210_v39  ;;  %v229_v45 = vadd.f32 %v228_v43, %v208_v36 }
  0xf1   :  { %v235_v46 = vadd.f32 %v234_v44, %v212_v41  ;;  %230 = vadd.xlane.f32.xlu1 %v229_v45 }
  0xf5   :  { %236 = vadd.xlane.f32.xlu1 %v235_v46 }
 0x176   :  { %v219_v47 = vpop.xlane.xlu0 %218 }
 0x17a   :  { %v225_v48 = vpop.xlane.xlu0 %224 }
 0x17b   :  { %v226_v50 = vadd.f32 %v225_v48, %v219_v47 }
 0x17e   :  { %v231_v49 = vpop.xlane.xlu1 %230 }
 0x17f   :  { %v232_v51 = vadd.f32 %v231_v49, %v226_v50 }
 0x182   :  { %v237_v52 = vpop.xlane.xlu1 %236 }
 0x183   :  { %v238_v53 = vadd.f32 %v237_v52, %v232_v51 }
 0x185   :  { %v239_v54 = vmul.f32 0.00048828125, %v238_v53 }
 0x187   :  { %v501_v55 = vsub.f32 %v147_v24, %v239_v54  ;;  %v503_v56 = vsub.f32 %v149_v26, %v239_v54  ;;  %v505_v57 = vsub.f32 %v200_v25, %v239_v54  ;;  %v507_v58 = vsub.f32 %v202_v27, %v239_v54 }
 0x188   :  { %v509_v59 = vsub.f32 %v143_v19, %v239_v54  ;;  %v511_v60 = vsub.f32 %v145_v21, %v239_v54  ;;  %v513_v61 = vsub.f32 %v196_v20, %v239_v54  ;;  %v515_v62 = vsub.f32 %v198_v22, %v239_v54 }
 0x189   :  { %v258_v63 = vmul.f32 %v501_v55, %v501_v55  ;;  %v259_v0 = vmul.f32 %v503_v56, %v503_v56  ;;  %v260_v1 = vmul.f32 %v505_v57, %v505_v57  ;;  %v261_v2 = vmul.f32 %v507_v58, %v507_v58 }
 0x18a   :  { %v244_v3 = vmul.f32 %v509_v59, %v509_v59  ;;  %v245_v4 = vmul.f32 %v511_v60, %v511_v60  ;;  %v246_v5 = vmul.f32 %v513_v61, %v513_v61  ;;  %v531_v7 = vsub.f32 %v157_v38, %v239_v54 }
 0x18b   :  { %v262_v6 = vadd.f32 %v259_v0, %v258_v63  ;;  %v533_v8 = vsub.f32 %v159_v40, %v239_v54  ;;  %v535_v9 = vsub.f32 %v210_v39, %v239_v54  ;;  %v247_v10 = vmul.f32 %v515_v62, %v515_v62 }
 0x18c   :  { %v248_v11 = vadd.f32 %v245_v4, %v244_v3  ;;  %v268_v12 = vsub.f32 %v153_v33, %v239_v54  ;;  %v269_v13 = vsub.f32 %v155_v35, %v239_v54  ;;  %v285_v15 = vsub.f32 %v212_v41, %v239_v54 }
 0x18d   :  { %v263_v14 = vadd.f32 %v262_v6, %v260_v1  ;;  %v286_v16 = vmul.f32 %v531_v7, %v531_v7  ;;  %v287_v17 = vmul.f32 %v533_v8, %v533_v8  ;;  %v288_v19 = vmul.f32 %v535_v9, %v535_v9 }
 0x18e   :  { %v249_v18 = vadd.f32 %v248_v11, %v246_v5  ;;  %v270_v20 = vsub.f32 %v206_v32, %v239_v54  ;;  %v271_v21 = vsub.f32 %v208_v36, %v239_v54  ;;  %v272_v24 = vmul.f32 %v268_v12, %v268_v12  ;;  %v297_v32 = vld [vmem:[%s609_s2] sm:$0xff] }
 0x18f   :  { %v264_v22 = vadd.f32 %v263_v14, %v261_v2  ;;  %v290_v23 = vadd.f32 %v287_v17, %v286_v16  ;;  %v273_v25 = vmul.f32 %v269_v13, %v269_v13  ;;  %v289_v27 = vmul.f32 %v285_v15, %v285_v15 }
 0x190   :  { %v250_v26 = vadd.f32 %v249_v18, %v247_v10  ;;  %v274_v29 = vmul.f32 %v270_v20, %v270_v20  ;;  %v275_v33 = vmul.f32 %v271_v21, %v271_v21  ;;  %v440_v36 = vmov 1  }
 0x191   :  { %265 = vadd.xlane.f32.xlu1 %v264_v22  ;;  %v291_v28 = vadd.f32 %v290_v23, %v288_v19  ;;  %v276_v30 = vadd.f32 %v273_v25, %v272_v24 }
 0x192   :  { %251 = vadd.xlane.f32.xlu0 %v250_v26  ;;  %417 = vset.pattern.permute.xlu1 %v440_v36 }
 0x193   :  { %v292_v31 = vadd.f32 %v291_v28, %v289_v27  ;;  %v277_v34 = vadd.f32 %v276_v30, %v274_v29 }
 0x195   :  { %293 = vadd.xlane.f32.xlu1 %v292_v31  ;;  %v278_v35 = vadd.f32 %v277_v34, %v275_v33 }
 0x197   :  { %279 = vadd.xlane.f32.xlu0 %v278_v35 }
 0x1a6   :  { %312 = vperm.xlu1 %417, %v297_v32  }
 0x21e   :  { %v266_v38 = vpop.xlane.xlu1 %265 }
 0x21f   :  { %v252_v37 = vpop.xlane.xlu0 %251 }
 0x220   :  { %v267_v39 = vadd.f32 %v266_v38, %v252_v37 }
 0x222   :  { %v294_v42 = vpop.xlane.xlu1 %293 }
 0x224   :  { %v280_v40 = vpop.xlane.xlu0 %279 }
 0x225   :  { %v281_v41 = vadd.f32 %v280_v40, %v267_v39 }
 0x226   :  { %v313_v1 = vpop.permute.xlu1 %312 }
 0x227   :  { %v295_v43 = vadd.f32 %v294_v42, %v281_v41 }
 0x229   :  { %v296_v44 = vmul.f32 0.00048828125, %v295_v43 }
 0x22b   :  { %v298_v45 = vadd.f32 1e-05, %v296_v44 }
 0x22d   :  { %437 = vrsqrt.f32 %v298_v45 }
 0x237   :  { %v438_v46 = vpop.eup %437 }
 0x238   :  { %v300_v47 = vmul.f32 %v438_v46, %v297_v32 }
 0x23a   :  { %303 = vperm.xlu0 %416, %v300_v47  }
 0x23e   :  { %418 = vset.pattern.permute.xlu0 %v440_v36 }
 0x2b9   :  { %v304_v48 = vpop.permute.xlu0 %303 }
 0x2ba   :  { %v306_v49 = vmul.f32 %v304_v48, %v509_v59  ;;  %v307_v50 = vmul.f32 %v304_v48, %v511_v60  ;;  %v308_v51 = vmul.f32 %v304_v48, %v513_v61  ;;  %v309_v52 = vmul.f32 %v304_v48, %v515_v62 }
 0x2bb   :  { %v327_v53 = vmul.f32 %v304_v48, %v501_v55  ;;  %v328_v54 = vmul.f32 %v304_v48, %v503_v56  ;;  %v329_v63 = vmul.f32 %v304_v48, %v505_v57  ;;  %v330_v0 = vmul.f32 %v304_v48, %v507_v58 }
 0x2bc   :  { %v344_v2 = vmul.f32 %v304_v48, %v268_v12  ;;  %v345_v3 = vmul.f32 %v304_v48, %v269_v13  ;;  %v346_v4 = vmul.f32 %v304_v48, %v270_v20  ;;  %v347_v5 = vmul.f32 %v304_v48, %v271_v21 }
 0x2bd   :  { %v361_v59 = vmul.f32 %v304_v48, %v531_v7  ;;  %v362_v60 = vmul.f32 %v304_v48, %v533_v8  ;;  %v363_v61 = vmul.f32 %v304_v48, %v535_v9  ;;  %v364_v62 = vmul.f32 %v304_v48, %v285_v15 }
 0x2be   :  { %v315_v6 = vadd.f32 %v313_v1, %v306_v49  ;;  %v316_v55 = vadd.f32 %v313_v1, %v307_v50  ;;  %v317_v10 = vadd.f32 %v313_v1, %v308_v51  ;;  %v318_v56 = vadd.f32 %v313_v1, %v309_v52 }
 0x2bf   :  { %v331_v11 = vadd.f32 %v327_v53, %v313_v1  ;;  %v332_v57 = vadd.f32 %v328_v54, %v313_v1  ;;  %v333_v14 = vadd.f32 %v329_v63, %v313_v1  ;;  %v334_v58 = vadd.f32 %v330_v0, %v313_v1 }
 0x2c0   :  { %v319_v16 = vmax.f32 %v315_v6, 0.0  ;;  %v320_v12 = vmax.f32 %v316_v55, 0.0  ;;  %v321_v13 = vmax.f32 %v317_v10, 0.0  ;;  %v322_v17 = vmax.f32 %v318_v56, 0.0 }
 0x2c1   :  { %v335_v18 = vmax.f32 %v331_v11, 0.0  ;;  %v336_v19 = vmax.f32 %v332_v57, 0.0  ;;  %v337_v7 = vmax.f32 %v333_v14, 0.0  ;;  %v338_v20 = vmax.f32 %v334_v58, 0.0 }
 0x2c2   :  { %323 = vst [vmem:[%s610_s3] sm:$0xff] %v319_v16  ;;  %324 = vst [vmem:[%s610_s3 + $0x8] sm:$0xff] %v320_v12  ;;  %v348_v8 = vadd.f32 %v344_v2, %v313_v1  ;;  %v349_v9 = vadd.f32 %v345_v3, %v313_v1  ;;  %v350_v15 = vadd.f32 %v346_v4, %v313_v1 }
 0x2c3   :  { %325 = vst [vmem:[%s610_s3 + $0x10] sm:$0xff] %v321_v13  ;;  %326 = vst [vmem:[%s610_s3 + $0x18] sm:$0xff] %v322_v17  ;;  %v351_v21 = vadd.f32 %v347_v5, %v313_v1  ;;  %v365_v22 = vadd.f32 %v361_v59, %v313_v1  ;;  %v366_v23 = vadd.f32 %v362_v60, %v313_v1 }
 0x2c4   :  { %402 = vst [vmem:[%s610_s3 + $0x20] sm:$0xff] %v335_v18  ;;  %403 = vst [vmem:[%s610_s3 + $0x28] sm:$0xff] %v336_v19  ;;  %v367_v24 = vadd.f32 %v363_v61, %v313_v1  ;;  %v368_v25 = vadd.f32 %v364_v62, %v313_v1  ;;  %v352_v26 = vmax.f32 %v348_v8, 0.0  ;;  %v353_v27 = vmax.f32 %v349_v9, 0.0 }
 0x2c5   :  { %404 = vst [vmem:[%s610_s3 + $0x30] sm:$0xff] %v337_v7  ;;  %405 = vst [vmem:[%s610_s3 + $0x38] sm:$0xff] %v338_v20  ;;  %v354_v28 = vmax.f32 %v350_v15, 0.0  ;;  %v355_v29 = vmax.f32 %v351_v21, 0.0  ;;  %v369_v30 = vmax.f32 %v365_v22, 0.0  ;;  %v370_v31 = vmax.f32 %v366_v23, 0.0 }
 0x2c6   :  { %v371_v33 = vmax.f32 %v367_v24, 0.0  ;;  %v372_v34 = vmax.f32 %v368_v25, 0.0  ;;  %406 = vst [vmem:[%s610_s3 + $0x40] sm:$0xff] %v352_v26  ;;  %407 = vst [vmem:[%s610_s3 + $0x48] sm:$0xff] %v353_v27 }
 0x2c7   :  { %408 = vst [vmem:[%s610_s3 + $0x50] sm:$0xff] %v354_v28  ;;  %409 = vst [vmem:[%s610_s3 + $0x58] sm:$0xff] %v355_v29 }
 0x2c8   :  { %410 = vst [vmem:[%s610_s3 + $0x60] sm:$0xff] %v369_v30  ;;  %411 = vst [vmem:[%s610_s3 + $0x68] sm:$0xff] %v370_v31 }
 0x2c9   :  { %412 = vst [vmem:[%s610_s3 + $0x70] sm:$0xff] %v371_v33  ;;  %413 = vst [vmem:[%s610_s3 + $0x78] sm:$0xff] %v372_v34 }

</bundles_post_ra>
